<compile_context>
chip_gen: v6e
topology: v6e:2x2x1
jax: 0.10.0
libtpu: 0.0.40
codegen_flags: <defaults>
</compile_context>

<pallas_src>
import functools

import jax
import jax.numpy as jnp
from jax.experimental import pallas as pl
from jax.experimental.pallas import tpu as pltpu

LANE = 128
SUBLANE = 8


def _round_up(x, m):
    return ((x + m - 1) // m) * m


def _lanes(n):
    return _round_up(max(int(n), 1), LANE)


def _pick_rows(target_rows, total_rows):
    """Row-tile size: whole array if it fits in one block, else a multiple of 8."""
    target_rows = max(int(target_rows), SUBLANE)
    if target_rows >= total_rows:
        return total_rows                       # block dim == full array dim is legal
    return max(SUBLANE, (target_rows // SUBLANE) * SUBLANE)


def _vmem_budget_bytes():
    """~75% of physical VMEM (64 MiB/TC on v7x, 128 MiB on v5e/v6e)."""
    cap = 64 * 1024 * 1024
    try:
        cap = int(pltpu.get_tpu_info().vmem_capacity_bytes)
    except Exception:
        pass
    return max(16 * 1024 * 1024, (cap * 3) // 4)


# ---------------------------------------------------------------------------
# Kernels
# ---------------------------------------------------------------------------
def _ranking_kernel_packed(x_ref, w1_ref, b1_ref, w2_ref, b2_ref, out_ref):
    # x_ref : (tbp, P*D_in) lane-dense packed rows (P logical rows per VMEM row)
    # w1_ref: (P*D_in, P*H) block-diagonal fc1 weight (VMEM resident)
    # b1_ref: (1, P*H)      tiled fc1 bias
    # w2_ref: (P*H, P)      block-diagonal fc2 weight (column per packed slot)
    # b2_ref: (1,)          SMEM scalar
    # out_ref: (tbp, P)     -> reshaped to (B, 1) in the wrapper (free)
    h = jnp.dot(x_ref[...], w1_ref[...], preferred_element_type=jnp.float32)
    h = jnp.maximum(h + b1_ref[...], 0.0)
    y = jnp.dot(h, w2_ref[...], preferred_element_type=jnp.float32)
    out_ref[...] = (y + b2_ref[0]).astype(out_ref.dtype)


def _ranking_kernel_generic(x_ref, w1_ref, b1_ref, w2_ref, b2_ref, out_ref, acc_ref):
    # Grid = (batch tiles, K tiles). acc_ref: (tb, H) f32 accumulator (resident over K).
    k = pl.program_id(1)

    @pl.when(k == 0)
    def _():
        acc_ref[...] = jnp.zeros_like(acc_ref)

    acc_ref[...] += jnp.dot(x_ref[...], w1_ref[...], preferred_element_type=jnp.float32)

    @pl.when(k == pl.num_programs(1) - 1)
    def _():
        h = jnp.maximum(acc_ref[...] + b1_ref[...], 0.0)
        # fc2 (N=1) as a lane reduction instead of an under-utilized second matmul.
        y = jnp.sum(h * w2_ref[...], axis=-1, keepdims=True)
        out_ref[...] = (y + b2_ref[0]).astype(out_ref.dtype)


# ---------------------------------------------------------------------------
# Wrapper
# ---------------------------------------------------------------------------
@functools.partial(jax.jit, static_argnames=("block_rows",))
def ranking_model_forward(x, w1, b1, w2, b2, *, block_rows=None):
    """x: (B, D_in) f32 or bf16 (used as-is, never recast);
    w1: (D_in, H) == fc1.weight.T; b1: (H,); w2: (H, 1) == fc2.weight.T; b2: (1,).
    Returns (B, 1) float32, matching RankingModel.forward.
    block_rows: optional cap on logical rows per tile (testing / tuning)."""
    B, D_in = x.shape
    H = w1.shape[-1]
    x_bytes = jnp.dtype(x.dtype).itemsize
    budget = _vmem_budget_bytes()
    target_stream_bytes = 4 * 1024 * 1024      # >= ~4 MiB of x per grid step

    b1_row = b1.reshape(1, H).astype(jnp.float32)
    w2_col = w2.reshape(H, 1).astype(jnp.float32)
    b2_s = b2.reshape(1).astype(jnp.float32)
    w1_c = w1.astype(x.dtype)                   # tiny one-time weight cast; x untouched

    flops = 2 * B * D_in * H + 2 * B * H

    # ---------------- lane-dense packed path (small D_in) ----------------
    P = LANE // D_in if (0 < D_in < LANE and LANE % D_in == 0) else 1
    PD, PH = P * D_in, P * H
    packed_w_bytes = (2 * _round_up(PD, SUBLANE) * _lanes(PH) * x_bytes
                      + 2 * _round_up(PH, SUBLANE) * _lanes(P) * 4)
    use_packed = (P > 1) and (B % P == 0) and (packed_w_bytes <= budget // 4)

    if use_packed:
        Bp = B // P
        xp = x.reshape(Bp, PD)                               # contiguous view, no copy
        w1_bd = jnp.kron(jnp.eye(P, dtype=x.dtype), w1_c)    # (PD, PH) block-diagonal
        w2_bd = jnp.kron(jnp.eye(P, dtype=jnp.float32), w2_col)  # (PH, P)
        b1_t = jnp.tile(b1_row, (1, P))                      # (1, PH)

        # Per-packed-row VMEM: x (2 bufs) + h temp + out (2 bufs, lane padded).
        per_row = 2 * _lanes(PD) * x_bytes + 2 * _lanes(PH) * 4 + 2 * _lanes(P) * 4
        resident = packed_w_bytes + 2 * SUBLANE * _lanes(PH) * 4
        cap_rows = max(SUBLANE, (budget - resident - (2 << 20)) // per_row)

        tbp_target = max(target_stream_bytes // (PD * x_bytes), SUBLANE)
        if block_rows is not None:
            tbp_target = min(tbp_target, max(1, block_rows // P))
        tbp = _pick_rows(min(tbp_target, cap_rows), Bp)

        out = pl.pallas_call(
            _ranking_kernel_packed,
            out_shape=jax.ShapeDtypeStruct((Bp, P), jnp.float32),
            grid=(pl.cdiv(Bp, tbp),),
            in_specs=[
                pl.BlockSpec((tbp, PD), lambda i: (i, 0)),       # streamed x
                pl.BlockSpec((PD, PH), lambda i: (0, 0)),        # resident fc1 (blockdiag)
                pl.BlockSpec((1, PH), lambda i: (0, 0)),         # resident bias1 (tiled)
                pl.BlockSpec((PH, P), lambda i: (0, 0)),         # resident fc2 (blockdiag)
                pl.BlockSpec(memory_space=pltpu.MemorySpace.SMEM),  # scalar bias2
            ],
            out_specs=pl.BlockSpec((tbp, P), lambda i: (i, 0)),
            compiler_params=pltpu.CompilerParams(
                dimension_semantics=("parallel",),       # megacore split on v7x
                vmem_limit_bytes=budget,
            ),
            cost_estimate=pl.CostEstimate(
                flops=flops, transcendentals=0,
                bytes_accessed=B * D_in * x_bytes + B * 4 + PD * PH * x_bytes,
            ),
        )(xp, w1_bd, b1_t, w2_bd, b2_s)
        return out.reshape(B, 1)                      # free row-major reshape

    # ---------------- generic path (any D_in, ragged B) ----------------
    h_lanes = _lanes(H)
    # K-tile fc1 only if a fully resident (double-buffered) weight would blow the
    # budget AND D_in admits a clean multiple-of-128 tile (no uneven K padding).
    tk = D_in
    if 2 * _round_up(D_in, SUBLANE) * h_lanes * x_bytes > budget // 3 and D_in % LANE == 0:
        tk = LANE
        cand = D_in
        while cand >= LANE:
            if D_in % cand == 0 and 2 * cand * h_lanes * x_bytes <= budget // 3:
                tk = cand
                break
            cand -= LANE
    nk = D_in // tk

    resident = 2 * _round_up(tk, SUBLANE) * h_lanes * x_bytes + 4 * SUBLANE * h_lanes * 4
    per_row = (2 * _lanes(tk) * x_bytes       # x double buffer (lane padded)
               + 2 * h_lanes * 4              # acc scratch + h temp
               + 2 * LANE * 4)                # (tb, 1) out double buffer (lane padded)
    cap_rows = max(SUBLANE, (budget - resident - (2 << 20)) // per_row)

    tb_target = max(target_stream_bytes // max(D_in * x_bytes, 1), SUBLANE)
    if block_rows is not None:
        tb_target = min(tb_target, block_rows)
    tb = _pick_rows(min(tb_target, cap_rows), B)

    out = pl.pallas_call(
        _ranking_kernel_generic,
        out_shape=jax.ShapeDtypeStruct((B, 1), jnp.float32),
        grid=(pl.cdiv(B, tb), nk),
        in_specs=[
            pl.BlockSpec((tb, tk), lambda i, k: (i, k)),        # streamed x
            pl.BlockSpec((tk, H), lambda i, k: (k, 0)),         # fc1 weight (K-tiled)
            pl.BlockSpec((1, H), lambda i, k: (0, 0)),          # resident bias1
            pl.BlockSpec((1, H), lambda i, k: (0, 0)),          # resident fc2 row
            pl.BlockSpec(memory_space=pltpu.MemorySpace.SMEM),  # scalar bias2
        ],
        out_specs=pl.BlockSpec((tb, 1), lambda i, k: (i, 0)),
        scratch_shapes=[pltpu.VMEM((tb, H), jnp.float32)],
        compiler_params=pltpu.CompilerParams(
            dimension_semantics=("parallel", "arbitrary"),
            vmem_limit_bytes=budget,
        ),
        cost_estimate=pl.CostEstimate(
            flops=flops, transcendentals=0,
            bytes_accessed=B * D_in * x_bytes + B * 4 + D_in * H * x_bytes,
        ),
    )(x, w1_c, b1_row, w2_col.reshape(1, H), b2_s)
    return out


def init_params(key, input_size, hidden_size):
    """Deterministic init mimicking nn.Linear default (uniform +/- 1/sqrt(fan_in))."""
    k1, k2, k3, k4 = jax.random.split(key, 4)
    bound1 = 1.0 / jnp.sqrt(input_size)
    bound2 = 1.0 / jnp.sqrt(hidden_size)
    # stored as (in, out) == PyTorch weight.T
    w1 = jax.random.uniform(k1, (input_size, hidden_size), jnp.float32, -bound1, bound1)
    b1 = jax.random.uniform(k2, (hidden_size,), jnp.float32, -bound1, bound1)
    w2 = jax.random.uniform(k3, (hidden_size, 1), jnp.float32, -bound2, bound2)
    b2 = jax.random.uniform(k4, (1,), jnp.float32, -bound2, bound2)
    return w1, b1, w2, b2


if __name__ == "__main__":
    input_size = 16
    hidden_size = 32

    key = jax.random.PRNGKey(0)
    k_x, k_p, k_x2, k_x3 = jax.random.split(key, 4)
    w1, b1, w2, b2 = init_params(k_p, input_size, hidden_size)

    def ref(x):
        return jnp.maximum(x @ w1 + b1[None, :], 0.0) @ w2.reshape(-1, 1) + b2.reshape(1, 1)

    # 1) small batch -> lane-dense packed path, single tile
    x = jax.random.normal(k_x, (8, input_size), jnp.float32)
    out = jax.block_until_ready(ranking_model_forward(x, w1, b1, w2, b2))
    assert out.shape == (8, 1)
    assert jnp.allclose(out, ref(x), atol=1e-5, rtol=1e-5)

    # 2) larger batch, packed path; also force multiple tiles with a ragged last tile
    x2 = jax.random.normal(k_x2, (1000, input_size), jnp.float32)
    out2 = jax.block_until_ready(ranking_model_forward(x2, w1, b1, w2, b2))
    assert out2.shape == (1000, 1)
    assert jnp.allclose(out2, ref(x2), atol=1e-5, rtol=1e-5)
    out2b = jax.block_until_ready(
        ranking_model_forward(x2, w1, b1, w2, b2, block_rows=512))
    assert jnp.allclose(out2b, ref(x2), atol=1e-5, rtol=1e-5)

    # 3) ragged batch (B % 8 != 0) -> generic path (no jnp.pad); also force a ragged tile
    x3 = jax.random.normal(k_x3, (13, input_size), jnp.float32)
    out3 = jax.block_until_ready(ranking_model_forward(x3, w1, b1, w2, b2))
    assert out3.shape == (13, 1)
    assert jnp.allclose(out3, ref(x3), atol=1e-5, rtol=1e-5)
    out3b = jax.block_until_ready(
        ranking_model_forward(x3, w1, b1, w2, b2, block_rows=8))
    assert jnp.allclose(out3b, ref(x3), atol=1e-5, rtol=1e-5)

    # 4) x arriving natively in bf16 (no wrapper cast) -> bf16 MXU inputs, f32 accumulate
    out4 = jax.block_until_ready(
        ranking_model_forward(x2.astype(jnp.bfloat16), w1, b1, w2, b2))
    assert jnp.allclose(out4, ref(x2), atol=5e-2, rtol=5e-2)

    print("KERNEL_OK")
</pallas_src>

<mosaic_0001>
module attributes {stable_mosaic.version = 11 : i64} {
  func.func @_ranking_kernel_packed(%arg0: i32, %arg1: memref<1x128xf32, #tpu.memory_space<vmem>>, %arg2: memref<128x256xf32, #tpu.memory_space<vmem>>, %arg3: memref<1x256xf32, #tpu.memory_space<vmem>>, %arg4: memref<256x8xf32, #tpu.memory_space<vmem>>, %arg5: memref<1xf32, #tpu.memory_space<smem>>, %arg6: memref<1x8xf32, #tpu.memory_space<vmem>>) attributes {dimension_semantics = [#tpu.dimension_semantics<parallel>], iteration_bounds = array<i64: 1>, scalar_prefetch = 0 : i64, scratch_operands = 0 : i64, tpu.core_type = #tpu.core_type<tc>, window_params = [{transform_indices = @transform_0, window_bounds = array<i64: 1, 128>}, {pipeline_mode = #tpu.pipeline_mode<synchronous>, transform_indices = @transform_1, window_bounds = array<i64: 128, 256>}, {pipeline_mode = #tpu.pipeline_mode<synchronous>, transform_indices = @transform_2, window_bounds = array<i64: 1, 256>}, {pipeline_mode = #tpu.pipeline_mode<synchronous>, transform_indices = @transform_3, window_bounds = array<i64: 256, 8>}, {transform_indices = @transform_4, window_bounds = array<i64: 1>}, {transform_indices = @transform_5, window_bounds = array<i64: 1, 8>}]} {
    %c0 = arith.constant 0 : index
    %c0_0 = arith.constant 0 : index
    %0 = vector.load %arg1[%c0, %c0_0] : memref<1x128xf32, #tpu.memory_space<vmem>>, vector<1x128xf32>
    %c0_1 = arith.constant 0 : index
    %c0_2 = arith.constant 0 : index
    %1 = vector.load %arg2[%c0_1, %c0_2] : memref<128x256xf32, #tpu.memory_space<vmem>>, vector<128x256xf32>
    %cst = arith.constant dense<0.000000e+00> : vector<1x256xf32>
    %2 = tpu.matmul %0, %1, %cst {dimension_numbers = #tpu.dot_dimension_numbers<[1], [0], [0], [1], [0, 0, 1, 1], [], []>} : vector<1x128xf32>, vector<128x256xf32>, vector<1x256xf32> -> vector<1x256xf32>
    %c0_3 = arith.constant 0 : index
    %c0_4 = arith.constant 0 : index
    %3 = vector.load %arg3[%c0_3, %c0_4] : memref<1x256xf32, #tpu.memory_space<vmem>>, vector<1x256xf32>
    %4 = arith.addf %2, %3 : vector<1x256xf32>
    %cst_5 = arith.constant 0.000000e+00 : f32
    %5 = vector.broadcast %cst_5 : f32 to vector<1x256xf32>
    %6 = arith.maximumf %4, %5 : vector<1x256xf32>
    %c0_6 = arith.constant 0 : index
    %c0_7 = arith.constant 0 : index
    %7 = vector.load %arg4[%c0_6, %c0_7] : memref<256x8xf32, #tpu.memory_space<vmem>>, vector<256x8xf32>
    %cst_8 = arith.constant dense<0.000000e+00> : vector<1x8xf32>
    %8 = tpu.matmul %6, %7, %cst_8 {dimension_numbers = #tpu.dot_dimension_numbers<[1], [0], [0], [1], [0, 0, 1, 1], [], []>} : vector<1x256xf32>, vector<256x8xf32>, vector<1x8xf32> -> vector<1x8xf32>
    %c0_9 = arith.constant 0 : index
    %9 = memref.load %arg5[%c0_9] : memref<1xf32, #tpu.memory_space<smem>>
    %10 = vector.broadcast %9 : f32 to vector<1x8xf32>
    %11 = arith.addf %8, %10 : vector<1x8xf32>
    %c0_10 = arith.constant 0 : index
    %c0_11 = arith.constant 0 : index
    %12 = vector.load %arg6[%c0_10, %c0_11] : memref<1x8xf32, #tpu.memory_space<vmem>>, vector<1x8xf32>
    tpu.vector_store %arg6[%c0_10, %c0_11], %11 {strides = array<i32>} : memref<1x8xf32, #tpu.memory_space<vmem>>, vector<1x8xf32>,
    return
  }
  func.func @transform_0(%arg0: i32) -> (i32, i32) {
    %c0_i32 = arith.constant 0 : i32
    %c0_i32_0 = arith.constant 0 : i32
    return %arg0, %c0_i32 : i32, i32
  }
  func.func @transform_1(%arg0: i32) -> (i32, i32) {
    %c0_i32 = arith.constant 0 : i32
    %c0_i32_0 = arith.constant 0 : i32
    %c0_i32_1 = arith.constant 0 : i32
    return %c0_i32, %c0_i32_0 : i32, i32
  }
  func.func @transform_2(%arg0: i32) -> (i32, i32) {
    %c0_i32 = arith.constant 0 : i32
    %c0_i32_0 = arith.constant 0 : i32
    %c0_i32_1 = arith.constant 0 : i32
    return %c0_i32, %c0_i32_0 : i32, i32
  }
  func.func @transform_3(%arg0: i32) -> (i32, i32) {
    %c0_i32 = arith.constant 0 : i32
    %c0_i32_0 = arith.constant 0 : i32
    %c0_i32_1 = arith.constant 0 : i32
    return %c0_i32, %c0_i32_0 : i32, i32
  }
  func.func @transform_4(%arg0: i32) -> i32 {
    %c0_i32 = arith.constant 0 : i32
    %c0_i32_0 = arith.constant 0 : i32
    return %c0_i32 : i32
  }
  func.func @transform_5(%arg0: i32) -> (i32, i32) {
    %c0_i32 = arith.constant 0 : i32
    %c0_i32_0 = arith.constant 0 : i32
    return %arg0, %c0_i32 : i32, i32
  }
}

</mosaic_0001>

<bundles_post_ra>
// kernel: ranking_model_forward.1
= control target key start
LH: loop header
LB: loop body
LE: loop exit
PB: predicated region body
PF: predicated region fallthrough
CT: control target
= control target key end

     0   :  { %v319_v4 = vmov 0.0   ;;  %s555_s0 = inlined_call_operand.vmem [shape: f32[1,128], index: 0, kind: input, shape index: {}]   ;;  %s556_s1 = inlined_call_operand.vmem [shape: f32[128,256], index: 1, kind: input, shape index: {}]   ;;  %s557_s2 = inlined_call_operand.vmem [shape: f32[1,256], index: 2, kind: input, shape index: {}]   ;;  %s558_s3 = inlined_call_operand.vmem [shape: f32[256,8], index: 3, kind: input, shape index: {}]   ;;  %s559_s4 = inlined_call_operand.<no memory space> [shape: f32[1], index: 4, kind: input, shape index: {}]   ;;  %s560_s5 = inlined_call_operand.hbm [shape: f32[1,8], index: 5, kind: output, shape index: {}]  }
   0x1   :  { %v54_v0 = vld [vmem:[%s556_s1 + $0xf8] sm:$0xff]  ;;  %v53_v1 = vld [vmem:[%s556_s1 + $0xf0] sm:$0xff]  ;;  %v52_v2 = vld [vmem:[%s556_s1 + $0xe8] sm:$0xff]  ;;  %131 = vmatprep.mubr.f32.mxu0 %v319_v4 }
   0x2   :  { %67 = vmatprep.subr.mxu0 %v54_v0  ;;  %v51_v3 = vld [vmem:[%s556_s1 + $0xe0] sm:$0xff]  ;;  %v50_v5 = vld [vmem:[%s556_s1 + $0xd8] sm:$0xff]  ;;  %v49_v6 = vld [vmem:[%s556_s1 + $0xd0] sm:$0xff] }
   0x3   :  { %68 = vmatpush1.msra.mxu0 %v53_v1  ;;  %v48_v7 = vld [vmem:[%s556_s1 + $0xc8] sm:$0xff]  ;;  %v47_v8 = vld [vmem:[%s556_s1 + $0xc0] sm:$0xff]  ;;  %v46_v9 = vld [vmem:[%s556_s1 + $0xb8] sm:$0xff] }
   0x4   :  { %69 = vmatprep.subr.mxu0 %v52_v2  ;;  %v45_v10 = vld [vmem:[%s556_s1 + $0xb0] sm:$0xff]  ;;  %v44_v11 = vld [vmem:[%s556_s1 + $0xa8] sm:$0xff]  ;;  %v43_v12 = vld [vmem:[%s556_s1 + $0xa0] sm:$0xff] }
   0x5   :  { %70 = vmatpush1.msra.mxu0 %v51_v3  ;;  %v42_v13 = vld [vmem:[%s556_s1 + $0x98] sm:$0xff]  ;;  %v41_v14 = vld [vmem:[%s556_s1 + $0x90] sm:$0xff]  ;;  %v40_v18 = vld [vmem:[%s556_s1 + $0x88] sm:$0xff] }
   0x6   :  { %71 = vmatprep.subr.mxu0 %v50_v5  ;;  %v171_v15 = vld [vmem:[%s558_s3 + $0xf8] sm:$0xff]  ;;  %v170_v17 = vld [vmem:[%s558_s3 + $0xf0] sm:$0xff]  ;;  %v39_v20 = vld [vmem:[%s556_s1 + $0x80] sm:$0xff] }
   0x7   :  { %72 = vmatpush1.msra.mxu0 %v49_v6  ;;  %v155_v16 = vld [vmem:[%s558_s3 + $0x78] sm:$0xff]  ;;  %260 = vmatprep.subr.mxu1 %v171_v15  ;;  %v154_v19 = vld [vmem:[%s558_s3 + $0x70] sm:$0xff]  ;;  %v169_v21 = vld [vmem:[%s558_s3 + $0xe8] sm:$0xff] }
   0x8   :  { %73 = vmatprep.subr.mxu0 %v48_v7  ;;  %261 = vmatpush3.msra.mxu1 %v155_v16  ;;  %v38_v22 = vld [vmem:[%s556_s1 + $0x78] sm:$0xff]  ;;  %v153_v23 = vld [vmem:[%s558_s3 + $0x68] sm:$0xff]  ;;  %v37_v24 = vld [vmem:[%s556_s1 + $0x70] sm:$0xff] }
   0x9   :  { %74 = vmatpush1.msra.mxu0 %v47_v8  ;;  %262 = vmatprep.subr.mxu1 %v170_v17  ;;  %v168_v25 = vld [vmem:[%s558_s3 + $0xe0] sm:$0xff]  ;;  %v36_v26 = vld [vmem:[%s556_s1 + $0x68] sm:$0xff]  ;;  %v167_v29 = vld [vmem:[%s558_s3 + $0xd8] sm:$0xff] }
   0xa   :  { %75 = vmatprep.subr.mxu0 %v46_v9  ;;  %263 = vmatpush3.msra.mxu1 %v154_v19  ;;  %v152_v27 = vld [vmem:[%s558_s3 + $0x60] sm:$0xff]  ;;  %v34_v30 = vld [vmem:[%s556_s1 + $0x58] sm:$0xff]  ;;  %v33_v32 = vld [vmem:[%s556_s1 + $0x50] sm:$0xff] }
   0xb   :  { %76 = vmatpush1.msra.mxu0 %v45_v10  ;;  %264 = vmatprep.subr.mxu1 %v169_v21  ;;  %v35_v28 = vld [vmem:[%s556_s1 + $0x60] sm:$0xff]  ;;  %v151_v31 = vld [vmem:[%s558_s3 + $0x58] sm:$0xff]  ;;  %v166_v33 = vld [vmem:[%s558_s3 + $0xd0] sm:$0xff] }
   0xc   :  { %77 = vmatprep.subr.mxu0 %v44_v11  ;;  %265 = vmatpush3.msra.mxu1 %v153_v23 }
   0xd   :  { %78 = vmatpush1.msra.mxu0 %v43_v12  ;;  %266 = vmatprep.subr.mxu1 %v168_v25 }
   0xe   :  { %79 = vmatprep.subr.mxu0 %v42_v13  ;;  %267 = vmatpush3.msra.mxu1 %v152_v27 }
   0xf   :  { %80 = vmatpush1.msra.mxu0 %v41_v14 }
  0x10   :  { %81 = vmatprep.subr.mxu0 %v40_v18 }
  0x11   :  { %82 = vmatpush1.msra.mxu0 %v39_v20 }
  0x12   :  { %83 = vmatprep.subr.mxu0 %v38_v22 }
  0x13   :  { %84 = vmatpush1.msra.mxu0 %v37_v24 }
  0x14   :  { %85 = vmatprep.subr.mxu0 %v36_v26 }
  0x15   :  { %11 = vsyncpa [#allocation4], 0  ;;  %86 = vmatpush1.msra.mxu0 %v35_v28  ;;  %v32_v34 = vld [vmem:[%s556_s1 + $0x48] sm:$0xff]  ;;  %268 = vmatprep.subr.mxu1 %v167_v29  ;;  %v150_v35 = vld [vmem:[%s558_s3 + $0x50] sm:$0xff]  ;;  %v57_v2 = vlaneseq  ;;  %v173_v16 = vstv %s559_s4  ;;  %s320_s24 = smov [#allocation3]   ;;  %vm244_vm0 = vcmask 57344  }
  0x16   :  { %87 = vmatprep.subr.mxu0 %v34_v30  ;;  %v31_v36 = vld [vmem:[%s556_s1 + $0x40] sm:$0xff]  ;;  %269 = vmatpush3.msra.mxu1 %v151_v31  ;;  %v165_v37 = vld [vmem:[%s558_s3 + $0xc8] sm:$0xff]  ;;  %v30_v38 = vld [vmem:[%s556_s1 + $0x38] sm:$0xff]  ;;  %s252_s25 = sshll.u32 %s320_s24, 4  ;;  %s253_s25 = int_to_ptr.vmem [resolvable:$true] %s252_s25 }
  0x17   :  { %88 = vmatpush1.msra.mxu0 %v33_v32  ;;  %270 = vmatprep.subr.mxu1 %v166_v33  ;;  %v149_v39 = vld [vmem:[%s558_s3 + $0x48] sm:$0xff]  ;;  %v29_v40 = vld [vmem:[%s556_s1 + $0x30] sm:$0xff]  ;;  %v164_v41 = vld [vmem:[%s558_s3 + $0xc0] sm:$0xff]  ;;  %v58_v3 = vshrl.u32 %v57_v2, 7  ;;  %s301_s26 = scalar_lea.vmem %s253_s25, 32  ;;  %p302_p1 = scmp.lt.s32.totalorder %s253_s25, %s253_s25 }
  0x18   :  { %89 = vmatprep.subr.mxu0 %v32_v34  ;;  %271 = vmatpush3.msra.mxu1 %v150_v35  ;;  %v28_v42 = vld [vmem:[%s556_s1 + $0x28] sm:$0xff]  ;;  %v148_v43 = vld [vmem:[%s558_s3 + $0x40] sm:$0xff]  ;;  %v163_v45 = vld [vmem:[%s558_s3 + $0xb8] sm:$0xff] }
  0x19   :  { %90 = vmatpush1.msra.mxu0 %v31_v36  ;;  %272 = vmatprep.subr.mxu1 %v165_v37  ;;  %v27_v44 = vld [vmem:[%s556_s1 + $0x20] sm:$0xff]  ;;  %v26_v46 = vld [vmem:[%s556_s1 + $0x18] sm:$0xff]  ;;  %v25_v48 = vld [vmem:[%s556_s1 + $0x10] sm:$0xff]  ;;  %v59_v4 = vsub.s32 0, %v58_v3  ;;  %v63_v6 = vsub.s32 1, %v58_v3 }
  0x1a   :  { %91 = vmatprep.subr.mxu0 %v30_v38  ;;  %273 = vmatpush3.msra.mxu1 %v149_v39  ;;  %v147_v47 = vld [vmem:[%s558_s3 + $0x38] sm:$0xff]  ;;  %v162_v49 = vld [vmem:[%s558_s3 + $0xb0] sm:$0xff]  ;;  %v24_v50 = vld [vmem:[%s556_s1 + $0x8] sm:$0xff] }
  0x1b   :  { %92 = vmatpush1.msra.mxu0 %v29_v40  ;;  %274 = vmatprep.subr.mxu1 %v164_v41  ;;  %v146_v51 = vld [vmem:[%s558_s3 + $0x30] sm:$0xff]  ;;  %v23_v52 = vld [vmem:[%s556_s1] sm:$0xff]  ;;  %v161_v53 = vld [vmem:[%s558_s3 + $0xa8] sm:$0xff] }
  0x1c   :  { %93 = vmatprep.subr.mxu0 %v28_v42  ;;  %275 = vmatpush3.msra.mxu1 %v148_v43  ;;  %v22_v54 = vld [vmem:[%s555_s0] sm:$0x1]  ;;  %v145_v55 = vld [vmem:[%s558_s3 + $0x28] sm:$0xff]  ;;  %v159_v58 = vld [vmem:[%s558_s3 + $0x98] sm:$0xff] }
  0x1d   :  { %94 = vmatpush1.msra.mxu0 %v27_v44  ;;  %276 = vmatprep.subr.mxu1 %v163_v45  ;;  %v160_v56 = vld [vmem:[%s558_s3 + $0xa0] sm:$0xff]  ;;  %v143_v59 = vld [vmem:[%s558_s3 + $0x18] sm:$0xff]  ;;  %v158_v60 = vld [vmem:[%s558_s3 + $0x90] sm:$0xff] }
  0x1e   :  { %95 = vmatprep.subr.mxu0 %v26_v46  ;;  %277 = vmatpush3.msra.mxu1 %v147_v47  ;;  %v144_v57 = vld [vmem:[%s558_s3 + $0x20] sm:$0xff]  ;;  %v142_v61 = vld [vmem:[%s558_s3 + $0x10] sm:$0xff]  ;;  %v157_v62 = vld [vmem:[%s558_s3 + $0x88] sm:$0xff] }
  0x1f   :  { %96 = vmatpush1.msra.mxu0 %v25_v48  ;;  %278 = vmatprep.subr.mxu1 %v162_v49  ;;  %v141_v63 = vld [vmem:[%s558_s3 + $0x8] sm:$0xff]  ;;  %v156_v0 = vld [vmem:[%s558_s3 + $0x80] sm:$0xff] }
  0x20   :  { %97 = vmatprep.subr.mxu0 %v24_v50  ;;  %279 = vmatpush3.msra.mxu1 %v146_v51  ;;  %v140_v1 = vld [vmem:[%s558_s3] sm:$0xff] }
  0x21   :  { %98 = vmatpush1.msra.mxu0 %v23_v52  ;;  %280 = vmatprep.subr.mxu1 %v161_v53  ;;  %v55_v5 = vld [vmem:[%s557_s2] sm:$0x3]  ;;  %s297_s2 = scalar_lea.vmem %s253_s25, 16 }
  0x22   :  { %132 = vmatmul.mubr.f32.vlgmr.msra.gmra.mxu0 %v22_v54  ;;  %281 = vmatpush3.msra.mxu1 %v145_v55  ;;  %v60_v7 = vrot.slane %v55_v5, %v59_v4  ;;  %v64_v8 = vrot.slane %v55_v5, %v63_v6  ;;  %p298_p0 = scmp.ne.s32.totalorder %s253_s25, %s297_s2  ;;  %p303_p2 = scmp.lt.s32.totalorder %s301_s26, %s297_s2 }
  0x23   :  { %282 = vmatprep.subr.mxu1 %v160_v56 }
  0x24   :  { %283 = vmatpush3.msra.mxu1 %v144_v57  ;;  %p304_p3 = por %p303_p2, %p302_p1 }
  0x25   :  { %284 = vmatprep.subr.mxu1 %v159_v58 }
  0x26   :  { %285 = vmatpush3.msra.mxu1 %v143_v59  ;;  %p305_p4 = pnand %p304_p3, %p298_p0 }
  0x27   :  { %286 = vmatprep.subr.mxu1 %v158_v60 }
  0x28   :  { %287 = vmatpush3.msra.mxu1 %v142_v61 }
  0x29   :  { %288 = vmatprep.subr.mxu1 %v157_v62 }
  0x2a   :  { %289 = vmatpush3.msra.mxu1 %v141_v63 }
  0x2b   :  { %290 = vmatprep.subr.mxu1 %v156_v0 }
  0x2c   :  { %291 = vmatpush3.msra.mxu1 %v140_v1 }
  0xe2   :  { %v133_v9 = vpop.f32.mrf.mxu0 }
  0xe3   :  { %v134_v10 = vadd.f32 %v133_v9, %v60_v7 }
  0xe4   :  { %v135_v11 = vpop.f32.mrf.mxu0 }
  0xe5   :  { %v136_v12 = vadd.f32 %v135_v11, %v64_v8  ;;  %v138_v14 = vmax.f32 %v134_v10, 0.0 }
  0xe7   :  { %v139_v13 = vmax.f32 %v136_v12, 0.0 }
  0xe9   :  { %238 = vmatprep.mubr.f32.mxu1 %v139_v13 }
  0xea   :  { %239 = vmatmul.mubr.f32.vlgmr.msra.gmra.mxu1 %v138_v14 }
 0x1aa   :  { %v292_v15 = vpop.f32.mrf.mxu1 }
 0x1ac   :  { %v293_v17 = vpop.f32.mrf.mxu1 }
 0x1ad   :  { %v294_v18 = vadd.f32 %v293_v17, %v292_v15 }
 0x1af   :  { %v241_v19 = vadd.f32 %v294_v18, %v173_v16 }
 0x1b1   :  { %245 = vst.msk [vmem:[#allocation3] sm:$0x1] %vm244_vm0, %v241_v19 }
 0x1b2   :  { %308 = shalt.err (!%p305_p4)
}
 0x1b3   :  { %255 = dma.vmem_to_hbm [thread:$0]  %s253_s25, 16, %s560_s5, [#allocation4]  }
 0x1b4   :  { %317 = dma.done.wait [#allocation4], 16  }
 0x1b5   :  { %318 = vsyncadd [#allocation4], 4294967280 }
 0x1b6   :  { %259 = vsyncpa [#allocation4], 1 }

</bundles_post_ra>
